<compile_context>
chip_gen: v7x
topology: tpu7x:2x2x1
jax: 0.10.0
libtpu: 0.0.40
codegen_flags: <defaults>
</compile_context>

<pallas_src>
import numpy as np
import jax
import jax.numpy as jnp
from jax.experimental import pallas as pl
from jax.experimental.pallas import tpu as pltpu  # noqa: F401  (kept for TPU-specific tuning hooks)

NUM_TYPE = 4        # small example size (PyTorch: num_type)
DIM_EMB = 1         # fixed by the module (self.dim_embedding = 1)


def _identity_gather_kernel(emb_ref, out_ref):
    """Gather with indices = arange(num_type) is the identity: copy table -> (aliased) output.

    emb_ref: VMEM (1, num_type * dim_emb) f32  embedding table, lane-dense orientation
    out_ref: VMEM (1, num_type * dim_emb) f32  gathered rows (== table; HBM buffer aliased to input)
    """
    out_ref[...] = emb_ref[...]


def _make_mu_fn(num_type: int, dim_emb: int):
    """One jitted device op: lane-dense reshape + aliased grid-less Pallas identity gather."""

    @jax.jit
    def mu_fn(emb_weight):
        # (num_type, dim_emb) -> (1, num_type*dim_emb): lane-dense (last dim on the lane axis).
        # Inside jit this reshape is layout plumbing (contiguous, same size), effectively free.
        table = emb_weight.reshape(1, num_type * dim_emb)
        return pl.pallas_call(
            _identity_gather_kernel,
            out_shape=jax.ShapeDtypeStruct((1, num_type * dim_emb), emb_weight.dtype),
            # Identity gather: alias input 0 -> output 0, no extra HBM output allocation.
            input_output_aliases={0: 0},
            # Advisory: this custom call is launch-bound, not compute-bound.
            cost_estimate=pl.CostEstimate(
                flops=0, transcendentals=0,
                bytes_accessed=2 * num_type * dim_emb * 4),
            # No grid, no in/out specs: full-array blocks, single invocation, no per-step bookkeeping.
        )(table)

    return mu_fn


_MU_FN_CACHE = {}


def baseline_forward(emb_weight: jnp.ndarray, sample_dict: dict):
    """JAX/Pallas equivalent of Baseline.forward (== Baseline.intensity).

    emb_weight : (num_type, 1) float32 embedding table (nn.Embedding weight)
    sample_dict: {'ci': (batch, seq) int32}  -- 'ci' is read but unused, as in PyTorch.
    Returns    : list of num_type arrays, each of shape (1,)  (emb(i).squeeze(1)).
    """
    _ = sample_dict['ci']  # matches PyTorch: events.view(-1, 1) has no effect on the output
    num_type, dim_emb = emb_weight.shape

    key = (int(num_type), int(dim_emb), str(jnp.asarray(emb_weight).dtype))
    fn = _MU_FN_CACHE.get(key)
    if fn is None:
        fn = _make_mu_fn(num_type, dim_emb)
        _MU_FN_CACHE[key] = fn

    mu_vec = fn(emb_weight)                                   # one device dispatch, (1, num_type*dim_emb)
    # Single host transfer, then cheap numpy views -> list of num_type arrays of shape (1,).
    mu_host = np.asarray(jax.device_get(mu_vec)).reshape(num_type, dim_emb)
    return [mu_host[i] for i in range(num_type)]
    # TODO(synk): if 'ci' ever drives a real (batch*seq)-index gather, switch to
    # PrefetchScalarGridSpec with the flattened indices in SMEM driving a pl.Element row
    # index_map, keep the table VMEM-resident, emit a lane-dense (multiple-of-128) output,
    # and on v7x add a leading "parallel" grid axis sized for the 64 MiB VMEM budget.


if __name__ == "__main__":
    key = jax.random.PRNGKey(0)
    k_emb, k_ci = jax.random.split(key)

    # Deterministic parameter init, matching uniform_(0.01 / dim_embedding, 1).
    emb_weight = jax.random.uniform(
        k_emb, (NUM_TYPE, DIM_EMB), dtype=jnp.float32,
        minval=0.01 / DIM_EMB, maxval=1.0)

    # Example event sequence 'ci' (batch=2, seq=8) of type indices (unused by forward, as in PyTorch).
    ci = jax.random.randint(k_ci, (2, 8), minval=0, maxval=NUM_TYPE, dtype=jnp.int32)
    sample_dict = {"ci": ci}

    mu_c_list = baseline_forward(emb_weight, sample_dict)
    jax.block_until_ready(mu_c_list)  # no-op for host arrays; device sync already done by device_get

    # Reference check: each entry must equal the corresponding embedding row (shape (1,)).
    ref = [emb_weight[i] for i in range(NUM_TYPE)]
    for got, exp in zip(mu_c_list, ref):
        assert got.shape == (1,)
        assert jnp.allclose(got, exp, atol=1e-6), (got, exp)

    print("KERNEL_OK")
</pallas_src>

<mosaic_0001>
module attributes {stable_mosaic.version = 11 : i64} {
  func.func @_identity_gather_kernel(%arg0: memref<1x4xf32, #tpu.memory_space<vmem>>, %arg1: memref<1x4xf32, #tpu.memory_space<vmem>>) attributes {dimension_semantics = [], scalar_prefetch = 0 : i64, scratch_operands = 0 : i64, tpu.core_type = #tpu.core_type<tc>} {
    %c0 = arith.constant 0 : index
    %c0_0 = arith.constant 0 : index
    %0 = vector.load %arg0[%c0, %c0_0] : memref<1x4xf32, #tpu.memory_space<vmem>>, vector<1x4xf32>
    %c0_1 = arith.constant 0 : index
    %c0_2 = arith.constant 0 : index
    %1 = vector.load %arg1[%c0_1, %c0_2] : memref<1x4xf32, #tpu.memory_space<vmem>>, vector<1x4xf32>
    tpu.vector_store %arg1[%c0_1, %c0_2], %0 {strides = array<i32>} : memref<1x4xf32, #tpu.memory_space<vmem>>, vector<1x4xf32>,
    return
  }
}

</mosaic_0001>

<bundles_post_ra>
// kernel: mu_fn.1
= control target key start
LH: loop header
LB: loop body
LE: loop exit
PB: predicated region body
PF: predicated region fallthrough
CT: control target
= control target key end

     0   :  { %6 = vsyncpa [#allocation3], 0  ;;  %s125_s0 = inlined_call_operand.hbm [shape: f32[1,4], index: 0, kind: input, shape index: {}, may-alias: {0,1}]   ;;  %s126_s1 = inlined_call_operand.hbm [shape: f32[1,4], index: 1, kind: output, shape index: {}, may-alias: {0,1}]  }
   0x1   :  { %7 = vsyncpa [#allocation4], 0  ;;  %s89_s6 = smov [#allocation2]   ;;  %s41_s10 = scalar_lea.hbm %s125_s0, 16 }
   0x2   :  { %s14_s7 = sshll.u32 %s89_s6, 4  ;;  %p42_p0 = scmp.ne.s32.totalorder %s125_s0, %s41_s10  ;;  %s15_s7 = int_to_ptr.vmem [resolvable:$true] %s14_s7 }
   0x3   :  { %p45_p1 = scmp.lt.u32.totalorder %s41_s10, %s125_s0 }
   0x5   :  { %p47_p2 = pnand %p45_p1, %p42_p0 }
   0x7   :  { %50 = shalt.err (!%p47_p2)
}
   0x8   :  { %s51_s15 = scalar_lea.vmem %s15_s7, 16  ;;  %s55_s16 = scalar_lea.vmem %s15_s7, 32 }
   0x9   :  { %p52_p3 = scmp.ne.s32.totalorder %s15_s7, %s51_s15  ;;  %p56_p4 = scmp.lt.s32.totalorder %s15_s7, %s15_s7 }
   0xa   :  { %p57_p5 = scmp.lt.s32.totalorder %s55_s16, %s51_s15 }
   0xc   :  { %p58_p6 = por %p57_p5, %p56_p4 }
   0xe   :  { %p59_p7 = pnand %p58_p6, %p52_p3 }
  0x10   :  { %62 = shalt.err (!%p59_p7)
}
  0x11   :  { %17 = dma.hbm_to_vmem [thread:$0]  %s125_s0, 16, %s15_s7, [#allocation3]  }
  0x12   :  { %85 = dma.done.wait [#allocation3], 16  }
  0x13   :  { %86 = vsyncadd [#allocation3], 4294967280  ;;  %s90_s19 = smov [#allocation5]   ;;  %vm22_vm0 = vcmask 24576   ;;  %v21_v0 = vld [vmem:[#allocation2] sm:$0x1] }
  0x14   :  { %s30_s20 = sshll.u32 %s90_s19, 4  ;;  %23 = vst.msk [vmem:[#allocation5] sm:$0x1] %vm22_vm0, %v21_v0  ;;  %s31_s20 = int_to_ptr.vmem [resolvable:$true] %s30_s20 }
  0x15   :  { %s63_s21 = scalar_lea.vmem %s31_s20, 16  ;;  %s67_s22 = scalar_lea.vmem %s31_s20, 32 }
  0x16   :  { %p64_p8 = scmp.ne.s32.totalorder %s31_s20, %s63_s21  ;;  %p68_p9 = scmp.lt.s32.totalorder %s31_s20, %s31_s20 }
  0x17   :  { %p69_p10 = scmp.lt.s32.totalorder %s67_s22, %s63_s21 }
  0x19   :  { %p70_p11 = por %p69_p10, %p68_p9 }
  0x1b   :  { %p71_p12 = pnand %p70_p11, %p64_p8 }
  0x1d   :  { %74 = shalt.err (!%p71_p12)
}
  0x1e   :  { %s75_s0 = scalar_lea.hbm %s126_s1, 16 }
  0x1f   :  { %p76_p13 = scmp.ne.s32.totalorder %s126_s1, %s75_s0  ;;  %p79_p0 = scmp.lt.u32.totalorder %s75_s0, %s126_s1 }
  0x21   :  { %p81_p1 = pnand %p79_p0, %p76_p13 }
  0x23   :  { %84 = shalt.err (!%p81_p1)
}
  0x24   :  { %33 = dma.vmem_to_hbm [thread:$0]  %s31_s20, 16, %s126_s1, [#allocation4]  }
  0x25   :  { %87 = dma.done.wait [#allocation4], 16  }
  0x26   :  { %88 = vsyncadd [#allocation4], 4294967280 }
  0x27   :  { %37 = vsyncpa [#allocation3], 1 }
  0x28   :  { %38 = vsyncpa [#allocation4], 1 }

</bundles_post_ra>
